<compile_context>
chip_gen: v6e
topology: v6e:2x2x1
jax: 0.10.0
libtpu: 0.0.40
codegen_flags: <defaults>
</compile_context>

<pallas_src>
import jax
import jax.numpy as jnp
from jax.experimental import pallas as pl
from jax.experimental.pallas import tpu as pltpu


# ----------------------------- Pallas kernel ------------------------------- #

def _fused_proj_lpips_kernel(w_ref, b_ref, lw_ref, x1_ref, x2_ref, o_ref):
    """One grid step = (one batch element, one spatial tile of T pixels).

    w_ref  : (3, Cin)       x-dtype  projection weight (1x1 conv), transposed
    b_ref  : (3, 1)         f32      projection bias
    lw_ref : (3, 1)         f32      LPIPS per-channel lin weights
    x*_ref : (1, Cin, T)    x-dtype  feature tile, spatial axis on lanes
    o_ref  : (1, 1, 3, 1)   f32      per-tile, per-channel partial sums
    """
    x1 = x1_ref[0]                       # (Cin, T) view, no copy
    x2 = x2_ref[0]
    w = w_ref[...]                       # (3, Cin)

    # 1x1-conv projection: (3, Cin) @ (Cin, T) -> (3, T), f32 MXU accumulate.
    # Spatial axis stays on lanes -> lane-dense everywhere downstream.
    z1 = jnp.dot(w, x1, preferred_element_type=jnp.float32) + b_ref[...]
    z2 = jnp.dot(w, x2, preferred_element_type=jnp.float32) + b_ref[...]

    eps = 1e-10
    # LPIPS normalize_tensor: z / (sqrt(sum_c z^2) + eps).  Keep eps placement.
    # sqrt + approx reciprocal land on the EUP slot (free next to the DMA).
    inv1 = pl.reciprocal(
        jnp.sqrt(jnp.sum(z1 * z1, axis=0, keepdims=True)) + eps, approx=True)
    inv2 = pl.reciprocal(
        jnp.sqrt(jnp.sum(z2 * z2, axis=0, keepdims=True)) + eps, approx=True)

    d = z1 * inv1 - z2 * inv2            # (3, T), all-f32 VPU math
    wd = lw_ref[...] * (d * d)           # (3, T), lin weights broadcast on lanes

    # Per-tile partial: reduce lanes only -> (3,1) column (12 B writeback).
    # Batch/spatial/channel mean is finished in JAX.
    o_ref[0, 0, :, :] = jnp.sum(wd, axis=1, keepdims=True)


# ------------------------------ host helpers ------------------------------- #

def _vmem_plan():
    """Per-generation (input-tile budget, vmem_limit_bytes).

    v7x-class chips have only 64 MiB physical VMEM -> keep the double-buffered
    input footprint <= 16 MiB under the 32 MiB scoped limit.  v5e/v6e have
    128 MiB -> allow 32 MiB of inputs and raise the scoped limit to 48 MiB.
    Falls back to the conservative (v7x) plan if the query is unavailable.
    """
    phys = 64 << 20
    try:
        info_fn = getattr(pltpu, "get_tpu_info", None)
        if info_fn is not None:
            phys = int(getattr(info_fn(), "vmem_capacity_bytes", phys))
    except Exception:
        pass
    if phys <= (64 << 20):
        return 16 << 20, 32 << 20
    return 32 << 20, 48 << 20


def _pick_spatial_tile(hw, cin, itemsize, batch, input_budget_bytes):
    """Largest T (multiple of 128 dividing hw) whose double-buffered input
    footprint (2 inputs x 2 buffers x cin x T x itemsize) fits the budget,
    preferring tiles that leave >= 2 total grid steps (v7x dual-TC sharding)."""
    if hw % 128 != 0:
        # TODO(synk): pad ragged spatial maps (e.g. 14x14 / 7x7) and mask the
        # tail with a lane-iota compare before the partial sum.
        raise ValueError("H*W must be a multiple of 128")
    per_px = 4 * cin * itemsize                      # 2 inputs x 2 buffers
    max_t = max(128, min(hw, (input_budget_bytes // per_px) // 128 * 128))
    single_step_fallback = None
    for cand in range(max_t, 0, -128):               # largest first
        if hw % cand:
            continue
        if batch * (hw // cand) >= 2:                # keep both TCs fed
            return cand
        if single_step_fallback is None:
            single_step_fallback = cand
    return single_step_fallback if single_step_fallback is not None else 128


# ------------------------------ host wrapper ------------------------------- #

def contrastive_loss_conv_direction(f1_nchw, f2_nchw, proj_w, proj_b, lin_w):
    """f1, f2: (B, 256, H, W) NCHW.  proj_w: (3, 256), proj_b/lin_w: (3, 1).

    Returns the scalar loss.
    """
    B, Cin, H, W = f1_nchw.shape
    Cout = proj_w.shape[0]
    assert Cout == 3, "mode='direction' projects to 3 channels"
    assert Cin % 8 == 0
    HW = H * W

    # Keep activations at their incoming dtype (no wrapper-side f32->bf16
    # convert pass); bf16 is the fast path when the producer already emits it.
    cdtype = f1_nchw.dtype
    itemsize = jnp.dtype(cdtype).itemsize

    input_budget, vmem_limit = _vmem_plan()
    T = _pick_spatial_tile(HW, Cin, itemsize, B, input_budget)
    S = HW // T

    # NCHW -> (B, Cin, H*W) is a free reshape: spatial becomes the lane axis.
    x1 = f1_nchw.reshape(B, Cin, HW)
    x2 = f2_nchw.reshape(B, Cin, HW).astype(cdtype)
    w = proj_w.astype(cdtype)                 # 3 x Cin, negligible
    b = proj_b.astype(jnp.float32)
    lw = lin_w.astype(jnp.float32)

    partials = pl.pallas_call(
        _fused_proj_lpips_kernel,
        out_shape=jax.ShapeDtypeStruct((B, S, Cout, 1), jnp.float32),
        grid=(B, S),
        in_specs=[
            pl.BlockSpec((Cout, Cin), lambda bi, si: (0, 0)),
            pl.BlockSpec((Cout, 1), lambda bi, si: (0, 0)),
            pl.BlockSpec((Cout, 1), lambda bi, si: (0, 0)),
            pl.BlockSpec((1, Cin, T), lambda bi, si: (bi, 0, si)),
            pl.BlockSpec((1, Cin, T), lambda bi, si: (bi, 0, si)),
        ],
        out_specs=pl.BlockSpec((1, 1, Cout, 1), lambda bi, si: (bi, si, 0, 0)),
        compiler_params=pltpu.CompilerParams(
            dimension_semantics=("parallel", "parallel"),
            vmem_limit_bytes=vmem_limit,
        ),
    )(w, b, lw, x1, x2)

    # partials: (B, S, 3, 1) per-tile, per-channel sums -> global mean.
    return jnp.sum(partials) / (B * HW)


# --------------------------- pure-JAX reference ----------------------------- #

def _reference_loss(f1, f2, w, b, lw):
    B, Cin, H, W = f1.shape
    x1 = f1.reshape(B, Cin, H * W).astype(jnp.float32)
    x2 = f2.reshape(B, Cin, H * W).astype(jnp.float32)
    wf = w.astype(jnp.float32)
    z1 = jnp.einsum("oc,bct->bot", wf, x1) + b[None]
    z2 = jnp.einsum("oc,bct->bot", wf, x2) + b[None]
    eps = 1e-10
    n1 = jnp.sqrt(jnp.sum(z1 * z1, axis=1, keepdims=True))
    n2 = jnp.sqrt(jnp.sum(z2 * z2, axis=1, keepdims=True))
    d = z1 / (n1 + eps) - z2 / (n2 + eps)
    wd = jnp.sum(lw[None] * d * d, axis=1)          # (B, HW)
    return jnp.mean(wd)


# ----------------------------------- main ----------------------------------- #

if __name__ == "__main__":
    key = jax.random.PRNGKey(0)
    k_f1, k_f2, k_w, k_b, k_lin = jax.random.split(key, 5)

    B, Cin, H, W = 2, 256, 16, 16
    Cout = 3  # mode='direction': Conv2d(256, 3, kernel_size=1)

    # Deterministic synthetic parameters (PyTorch-default-like uniform bounds).
    bound = 1.0 / (float(Cin) ** 0.5)                # 1x1 kernel fan-in
    proj_w = jax.random.uniform(k_w, (Cout, Cin), jnp.float32, -bound, bound)
    proj_b = jax.random.uniform(k_b, (Cout, 1), jnp.float32, -bound, bound)
    # LPIPS lin weights are non-negative 1x1 conv weights (synthetic here).
    lin_w = jax.random.uniform(k_lin, (Cout, 1), jnp.float32, 0.0, 1.0)

    f1 = jax.random.normal(k_f1, (B, Cin, H, W), jnp.float32)
    f2 = jax.random.normal(k_f2, (B, Cin, H, W), jnp.float32)

    loss_fn = jax.jit(contrastive_loss_conv_direction)
    loss = loss_fn(f1, f2, proj_w, proj_b, lin_w)
    jax.block_until_ready(loss)

    # Tolerance check vs pure-f32 JAX reference (approx reciprocal + MXU
    # accumulation order make the kernel slightly non-bit-exact).
    ref = _reference_loss(f1, f2, proj_w, proj_b, lin_w)
    assert jnp.isfinite(loss), loss
    assert jnp.allclose(loss, ref, rtol=5e-2, atol=1e-4), (float(loss), float(ref))

    print("KERNEL_OK")
</pallas_src>

<mosaic_0001>
module attributes {stable_mosaic.version = 11 : i64} {
  func.func @_fused_proj_lpips_kernel(%arg0: i32, %arg1: i32, %arg2: memref<3x256xf32, #tpu.memory_space<vmem>>, %arg3: memref<3x1xf32, #tpu.memory_space<vmem>>, %arg4: memref<3x1xf32, #tpu.memory_space<vmem>>, %arg5: memref<1x256x256xf32, #tpu.memory_space<vmem>>, %arg6: memref<1x256x256xf32, #tpu.memory_space<vmem>>, %arg7: memref<1x1x3x1xf32, #tpu.memory_space<vmem>>) attributes {dimension_semantics = [#tpu.dimension_semantics<parallel>, #tpu.dimension_semantics<parallel>], iteration_bounds = array<i64: 2, 1>, scalar_prefetch = 0 : i64, scratch_operands = 0 : i64, tpu.core_type = #tpu.core_type<tc>, window_params = [{pipeline_mode = #tpu.pipeline_mode<synchronous>, transform_indices = @transform_0, window_bounds = array<i64: 3, 256>}, {pipeline_mode = #tpu.pipeline_mode<synchronous>, transform_indices = @transform_1, window_bounds = array<i64: 3, 1>}, {pipeline_mode = #tpu.pipeline_mode<synchronous>, transform_indices = @transform_2, window_bounds = array<i64: 3, 1>}, {transform_indices = @transform_3, window_bounds = array<i64: 1, 256, 256>}, {transform_indices = @transform_4, window_bounds = array<i64: 1, 256, 256>}, {transform_indices = @transform_5, window_bounds = array<i64: 1, 1, 3, 1>}]} {
    %c0 = arith.constant 0 : index
    %c0_0 = arith.constant 0 : index
    %c0_1 = arith.constant 0 : index
    %0 = vector.load %arg5[%c0, %c0_0, %c0_1] : memref<1x256x256xf32, #tpu.memory_space<vmem>>, vector<1x256x256xf32>
    %1 = vector.shape_cast %0 : vector<1x256x256xf32> to vector<256x256xf32>
    %c0_2 = arith.constant 0 : index
    %c0_3 = arith.constant 0 : index
    %c0_4 = arith.constant 0 : index
    %2 = vector.load %arg6[%c0_2, %c0_3, %c0_4] : memref<1x256x256xf32, #tpu.memory_space<vmem>>, vector<1x256x256xf32>
    %3 = vector.shape_cast %2 : vector<1x256x256xf32> to vector<256x256xf32>
    %c0_5 = arith.constant 0 : index
    %c0_6 = arith.constant 0 : index
    %4 = vector.load %arg2[%c0_5, %c0_6] : memref<3x256xf32, #tpu.memory_space<vmem>>, vector<3x256xf32>
    %cst = arith.constant dense<0.000000e+00> : vector<3x256xf32>
    %5 = tpu.matmul %4, %1, %cst {dimension_numbers = #tpu.dot_dimension_numbers<[1], [0], [0], [1], [0, 0, 1, 1], [], []>} : vector<3x256xf32>, vector<256x256xf32>, vector<3x256xf32> -> vector<3x256xf32>
    %c0_7 = arith.constant 0 : index
    %c0_8 = arith.constant 0 : index
    %6 = vector.load %arg3[%c0_7, %c0_8] : memref<3x1xf32, #tpu.memory_space<vmem>>, vector<3x1xf32>
    %7 = vector.broadcast %6 : vector<3x1xf32> to vector<3x256xf32>
    %8 = arith.addf %5, %7 : vector<3x256xf32>
    %cst_9 = arith.constant dense<0.000000e+00> : vector<3x256xf32>
    %9 = tpu.matmul %4, %3, %cst_9 {dimension_numbers = #tpu.dot_dimension_numbers<[1], [0], [0], [1], [0, 0, 1, 1], [], []>} : vector<3x256xf32>, vector<256x256xf32>, vector<3x256xf32> -> vector<3x256xf32>
    %c0_10 = arith.constant 0 : index
    %c0_11 = arith.constant 0 : index
    %10 = vector.load %arg3[%c0_10, %c0_11] : memref<3x1xf32, #tpu.memory_space<vmem>>, vector<3x1xf32>
    %11 = vector.broadcast %10 : vector<3x1xf32> to vector<3x256xf32>
    %12 = arith.addf %9, %11 : vector<3x256xf32>
    %13 = arith.mulf %8, %8 : vector<3x256xf32>
    %cst_12 = arith.constant dense<0.000000e+00> : vector<256xf32>
    %14 = vector.multi_reduction <add>, %13, %cst_12 [0] : vector<3x256xf32> to vector<256xf32>
    %15 = vector.shape_cast %14 : vector<256xf32> to vector<1x256xf32>
    %16 = math.sqrt %15 : vector<1x256xf32>
    %cst_13 = arith.constant 1.000000e-10 : f32
    %17 = vector.broadcast %cst_13 : f32 to vector<1x256xf32>
    %18 = arith.addf %16, %17 : vector<1x256xf32>
    %19 = tpu.reciprocal %18 {approx = true} : vector<1x256xf32> -> vector<1x256xf32>
    %20 = arith.mulf %12, %12 : vector<3x256xf32>
    %cst_14 = arith.constant dense<0.000000e+00> : vector<256xf32>
    %21 = vector.multi_reduction <add>, %20, %cst_14 [0] : vector<3x256xf32> to vector<256xf32>
    %22 = vector.shape_cast %21 : vector<256xf32> to vector<1x256xf32>
    %23 = math.sqrt %22 : vector<1x256xf32>
    %cst_15 = arith.constant 1.000000e-10 : f32
    %24 = vector.broadcast %cst_15 : f32 to vector<1x256xf32>
    %25 = arith.addf %23, %24 : vector<1x256xf32>
    %26 = tpu.reciprocal %25 {approx = true} : vector<1x256xf32> -> vector<1x256xf32>
    %27 = vector.broadcast %19 : vector<1x256xf32> to vector<3x256xf32>
    %28 = arith.mulf %8, %27 : vector<3x256xf32>
    %29 = vector.broadcast %26 : vector<1x256xf32> to vector<3x256xf32>
    %30 = arith.mulf %12, %29 : vector<3x256xf32>
    %31 = arith.subf %28, %30 : vector<3x256xf32>
    %c0_16 = arith.constant 0 : index
    %c0_17 = arith.constant 0 : index
    %32 = vector.load %arg4[%c0_16, %c0_17] : memref<3x1xf32, #tpu.memory_space<vmem>>, vector<3x1xf32>
    %33 = arith.mulf %31, %31 : vector<3x256xf32>
    %34 = vector.broadcast %32 : vector<3x1xf32> to vector<3x256xf32>
    %35 = arith.mulf %34, %33 : vector<3x256xf32>
    %cst_18 = arith.constant dense<0.000000e+00> : vector<3xf32>
    %36 = vector.multi_reduction <add>, %35, %cst_18 [1] : vector<3x256xf32> to vector<3xf32>
    %37 = vector.shape_cast %36 : vector<3xf32> to vector<3x1xf32>
    %c0_19 = arith.constant 0 : index
    %c0_20 = arith.constant 0 : index
    %c0_21 = arith.constant 0 : index
    %c0_22 = arith.constant 0 : index
    %38 = vector.load %arg7[%c0_19, %c0_20, %c0_21, %c0_22] : memref<1x1x3x1xf32, #tpu.memory_space<vmem>>, vector<1x1x3x1xf32>
    %39 = vector.shape_cast %38 : vector<1x1x3x1xf32> to vector<3x1xf32>
    %40 = vector.shape_cast %37 : vector<3x1xf32> to vector<1x1x3x1xf32>
    tpu.vector_store %arg7[%c0_19, %c0_20, %c0_21, %c0_22], %40 {strides = array<i32>} : memref<1x1x3x1xf32, #tpu.memory_space<vmem>>, vector<1x1x3x1xf32>,
    return
  }
  func.func @transform_0(%arg0: i32, %arg1: i32) -> (i32, i32) {
    %c0_i32 = arith.constant 0 : i32
    %c0_i32_0 = arith.constant 0 : i32
    %c0_i32_1 = arith.constant 0 : i32
    return %c0_i32, %c0_i32_0 : i32, i32
  }
  func.func @transform_1(%arg0: i32, %arg1: i32) -> (i32, i32) {
    %c0_i32 = arith.constant 0 : i32
    %c0_i32_0 = arith.constant 0 : i32
    %c0_i32_1 = arith.constant 0 : i32
    return %c0_i32, %c0_i32_0 : i32, i32
  }
  func.func @transform_2(%arg0: i32, %arg1: i32) -> (i32, i32) {
    %c0_i32 = arith.constant 0 : i32
    %c0_i32_0 = arith.constant 0 : i32
    %c0_i32_1 = arith.constant 0 : i32
    return %c0_i32, %c0_i32_0 : i32, i32
  }
  func.func @transform_3(%arg0: i32, %arg1: i32) -> (i32, i32, i32) {
    %c0_i32 = arith.constant 0 : i32
    %c0_i32_0 = arith.constant 0 : i32
    return %arg0, %c0_i32, %arg1 : i32, i32, i32
  }
  func.func @transform_4(%arg0: i32, %arg1: i32) -> (i32, i32, i32) {
    %c0_i32 = arith.constant 0 : i32
    %c0_i32_0 = arith.constant 0 : i32
    return %arg0, %c0_i32, %arg1 : i32, i32, i32
  }
  func.func @transform_5(%arg0: i32, %arg1: i32) -> (i32, i32, i32, i32) {
    %c0_i32 = arith.constant 0 : i32
    %c0_i32_0 = arith.constant 0 : i32
    %c0_i32_1 = arith.constant 0 : i32
    return %arg0, %arg1, %c0_i32, %c0_i32_0 : i32, i32, i32, i32
  }
}

</mosaic_0001>

<bundles_post_ra>
// kernel: contrastive_loss_conv_direction.1
= control target key start
LH: loop header
LB: loop body
LE: loop exit
PB: predicated region body
PF: predicated region fallthrough
CT: control target
= control target key end

     0   :  { %s874_s18 = smov 0   ;;  %s876_s19 = smov 0   ;;  %s1087_s0 = inlined_call_operand.vmem [shape: f32[3,256], index: 0, kind: input, shape index: {}]   ;;  %s1088_s1 = inlined_call_operand.vmem [shape: f32[3,1], index: 1, kind: input, shape index: {}]   ;;  %s1089_s2 = inlined_call_operand.vmem [shape: f32[3,1], index: 2, kind: input, shape index: {}]   ;;  %s1090_s3 = inlined_call_operand.vmem [shape: f32[2,256,256], index: 3, kind: input, shape index: {}]   ;;  %s1091_s4 = inlined_call_operand.vmem [shape: f32[2,256,256], index: 4, kind: input, shape index: {}]   ;;  %s1092_s5 = inlined_call_operand.vmem [shape: f32[2,1,3,1], index: 5, kind: output, shape index: {}]  }
   0x1   :  { %s878_s20 = smov 0  }
   0x2 LB: > { %s27_s21 = sadd.s32 1, %s837_s19  ;;  %p766_p0 = scmp.ge.s32.totalorder %s841_s20, 1  ;;  %s841_s20 = sphi %s878_s20, %s15_s20   ;;  %s837_s19 = sphi %s876_s19, %s1094_s19   ;;  %s833_s18 = sphi %s874_s18, %s1093_s18  }
   0x3   : > { %p29_p1 = scmp.ge.s32.totalorder %s27_s21, 2  ;;  %p225_p2 = scmp.lt.s32.totalorder %s841_s20, 3 }
   0x5   : > { %s1096_s21 = smov (%p29_p1, %s27_s21), 0  ;;  %p226_p3 = pnand %p766_p0, %p225_p2 }
   0x6   : > { %p269_p4 = scmp.lt.s32.totalorder (!%p226_p3), %s833_s18, 1 }
   0x7   : > { %229 = sbr.rel (%p226_p3) target bundleno = 478 (0x1de), region = 40 }
   0xc   : > { %v895_v0 = vld [vmem:[%s1087_s0] sm:$0x77]  ;;  %v843_v3 = vmov 0   ;;  %s1098_s18 = smov (!%p269_p4, %s833_s18), 1  ;;  %vm577_vm0 = vcmask 1042432   ;;  %vm665_vm9 = vcmask 2048  }
   0xd   : > { %v424_v1 = vld [vmem:[%s1088_s1] sm:$0x7]  ;;  %v431_v2 = vcombine.high %v895_v0, %v895_v0  ;;  %801 = vset.pattern.permute.xlu0 %v843_v3  ;;  %s774_s28 = sshll.u32 %s1098_s18, 9  ;;  %s771_s10 = sshll.u32 %s1098_s18, 2 }
   0xe   : > { %427 = vperm.xlu0 %801, %v424_v1   ;;  %v650_v4 = vld [vmem:[%s1089_s2] sm:$0x7]  ;;  %s911_s6 = scalar_lea.vmem %s1090_s3, %s774_s28  ;;  %s916_s9 = scalar_lea.vmem %s1091_s4, %s774_s28 }
   0xf   : > { %497 = vmatprep.mubr.f32.mxu0 %v431_v2  ;;  %568 = vmatprep.mubr.f32.mxu1 %v431_v2  ;;  %v326_v5 = vld [vmem:[%s911_s6 + $0xf8] sm:$0xff]  ;;  %v325_v7 = vld [vmem:[%s911_s6 + $0xf0] sm:$0xff]  ;;  %v324_v9 = vld [vmem:[%s911_s6 + $0xe8] sm:$0xff]  ;;  %s294_s13 = scalar_lea.vmem %s1092_s5, %s771_s10 }
  0x10   : > { %v390_v6 = vld [vmem:[%s916_s9 + $0xf8] sm:$0xff]  ;;  %433 = vmatprep.subr.mxu0 %v326_v5  ;;  %v389_v8 = vld [vmem:[%s916_s9 + $0xf0] sm:$0xff]  ;;  %v388_v10 = vld [vmem:[%s916_s9 + $0xe8] sm:$0xff] }
  0x11   : > { %504 = vmatprep.subr.mxu1 %v390_v6  ;;  %434 = vmatpush1.msra.mxu0 %v325_v7  ;;  %v323_v11 = vld [vmem:[%s911_s6 + $0xe0] sm:$0xff]  ;;  %v322_v13 = vld [vmem:[%s911_s6 + $0xd8] sm:$0xff]  ;;  %v321_v15 = vld [vmem:[%s911_s6 + $0xd0] sm:$0xff] }
  0x12   : > { %655 = vperm.xlu0 %801, %v650_v4   ;;  %505 = vmatpush1.msra.mxu1 %v389_v8  ;;  %v387_v12 = vld [vmem:[%s916_s9 + $0xe0] sm:$0xff]  ;;  %v386_v14 = vld [vmem:[%s916_s9 + $0xd8] sm:$0xff]  ;;  %v385_v16 = vld [vmem:[%s916_s9 + $0xd0] sm:$0xff] }
  0x13   : > { %435 = vmatprep.subr.mxu0 %v324_v9  ;;  %506 = vmatprep.subr.mxu1 %v388_v10  ;;  %v320_v17 = vld [vmem:[%s911_s6 + $0xc8] sm:$0xff]  ;;  %v319_v19 = vld [vmem:[%s911_s6 + $0xc0] sm:$0xff]  ;;  %v318_v21 = vld [vmem:[%s911_s6 + $0xb8] sm:$0xff] }
  0x14   : > { %436 = vmatpush1.msra.mxu0 %v323_v11  ;;  %507 = vmatpush1.msra.mxu1 %v387_v12  ;;  %v384_v18 = vld [vmem:[%s916_s9 + $0xc8] sm:$0xff]  ;;  %v383_v20 = vld [vmem:[%s916_s9 + $0xc0] sm:$0xff]  ;;  %v382_v22 = vld [vmem:[%s916_s9 + $0xb8] sm:$0xff] }
  0x15   : > { %437 = vmatprep.subr.mxu0 %v322_v13  ;;  %508 = vmatprep.subr.mxu1 %v386_v14  ;;  %v317_v23 = vld [vmem:[%s911_s6 + $0xb0] sm:$0xff]  ;;  %v316_v25 = vld [vmem:[%s911_s6 + $0xa8] sm:$0xff]  ;;  %v315_v27 = vld [vmem:[%s911_s6 + $0xa0] sm:$0xff] }
  0x16   : > { %438 = vmatpush1.msra.mxu0 %v321_v15  ;;  %509 = vmatpush1.msra.mxu1 %v385_v16  ;;  %v381_v24 = vld [vmem:[%s916_s9 + $0xb0] sm:$0xff]  ;;  %v380_v26 = vld [vmem:[%s916_s9 + $0xa8] sm:$0xff]  ;;  %v379_v28 = vld [vmem:[%s916_s9 + $0xa0] sm:$0xff] }
  0x17   : > { %439 = vmatprep.subr.mxu0 %v320_v17  ;;  %510 = vmatprep.subr.mxu1 %v384_v18  ;;  %v314_v29 = vld [vmem:[%s911_s6 + $0x98] sm:$0xff]  ;;  %v313_v31 = vld [vmem:[%s911_s6 + $0x90] sm:$0xff]  ;;  %v312_v33 = vld [vmem:[%s911_s6 + $0x88] sm:$0xff] }
  0x18   : > { %440 = vmatpush1.msra.mxu0 %v319_v19  ;;  %511 = vmatpush1.msra.mxu1 %v383_v20  ;;  %v378_v30 = vld [vmem:[%s916_s9 + $0x98] sm:$0xff]  ;;  %v377_v32 = vld [vmem:[%s916_s9 + $0x90] sm:$0xff]  ;;  %v376_v34 = vld [vmem:[%s916_s9 + $0x88] sm:$0xff] }
  0x19   : > { %441 = vmatprep.subr.mxu0 %v318_v21  ;;  %512 = vmatprep.subr.mxu1 %v382_v22  ;;  %v311_v35 = vld [vmem:[%s911_s6 + $0x80] sm:$0xff]  ;;  %v310_v37 = vld [vmem:[%s911_s6 + $0x78] sm:$0xff]  ;;  %v309_v39 = vld [vmem:[%s911_s6 + $0x70] sm:$0xff] }
  0x1a   : > { %442 = vmatpush1.msra.mxu0 %v317_v23  ;;  %513 = vmatpush1.msra.mxu1 %v381_v24  ;;  %v375_v36 = vld [vmem:[%s916_s9 + $0x80] sm:$0xff]  ;;  %v374_v38 = vld [vmem:[%s916_s9 + $0x78] sm:$0xff]  ;;  %v373_v40 = vld [vmem:[%s916_s9 + $0x70] sm:$0xff] }
  0x1b   : > { %443 = vmatprep.subr.mxu0 %v316_v25  ;;  %514 = vmatprep.subr.mxu1 %v380_v26  ;;  %v308_v41 = vld [vmem:[%s911_s6 + $0x68] sm:$0xff]  ;;  %v307_v43 = vld [vmem:[%s911_s6 + $0x60] sm:$0xff]  ;;  %v306_v45 = vld [vmem:[%s911_s6 + $0x58] sm:$0xff] }
  0x1c   : > { %444 = vmatpush1.msra.mxu0 %v315_v27  ;;  %515 = vmatpush1.msra.mxu1 %v379_v28  ;;  %v372_v42 = vld [vmem:[%s916_s9 + $0x68] sm:$0xff]  ;;  %v371_v44 = vld [vmem:[%s916_s9 + $0x60] sm:$0xff]  ;;  %v370_v46 = vld [vmem:[%s916_s9 + $0x58] sm:$0xff] }
  0x1d   : > { %445 = vmatprep.subr.mxu0 %v314_v29  ;;  %516 = vmatprep.subr.mxu1 %v378_v30  ;;  %v305_v47 = vld [vmem:[%s911_s6 + $0x50] sm:$0xff]  ;;  %v304_v49 = vld [vmem:[%s911_s6 + $0x48] sm:$0xff]  ;;  %v303_v51 = vld [vmem:[%s911_s6 + $0x40] sm:$0xff] }
  0x1e   : > { %446 = vmatpush1.msra.mxu0 %v313_v31  ;;  %517 = vmatpush1.msra.mxu1 %v377_v32  ;;  %v369_v48 = vld [vmem:[%s916_s9 + $0x50] sm:$0xff]  ;;  %v368_v50 = vld [vmem:[%s916_s9 + $0x48] sm:$0xff]  ;;  %v367_v52 = vld [vmem:[%s916_s9 + $0x40] sm:$0xff] }
  0x1f   : > { %447 = vmatprep.subr.mxu0 %v312_v33  ;;  %518 = vmatprep.subr.mxu1 %v376_v34  ;;  %v302_v53 = vld [vmem:[%s911_s6 + $0x38] sm:$0xff]  ;;  %v301_v55 = vld [vmem:[%s911_s6 + $0x30] sm:$0xff]  ;;  %v300_v57 = vld [vmem:[%s911_s6 + $0x28] sm:$0xff] }
  0x20   : > { %448 = vmatpush1.msra.mxu0 %v311_v35  ;;  %519 = vmatpush1.msra.mxu1 %v375_v36  ;;  %v366_v54 = vld [vmem:[%s916_s9 + $0x38] sm:$0xff]  ;;  %v365_v56 = vld [vmem:[%s916_s9 + $0x30] sm:$0xff]  ;;  %v364_v58 = vld [vmem:[%s916_s9 + $0x28] sm:$0xff] }
  0x21   : > { %449 = vmatprep.subr.mxu0 %v310_v37  ;;  %520 = vmatprep.subr.mxu1 %v374_v38  ;;  %v299_v59 = vld [vmem:[%s911_s6 + $0x20] sm:$0xff]  ;;  %v298_v61 = vld [vmem:[%s911_s6 + $0x18] sm:$0xff]  ;;  %v297_v63 = vld [vmem:[%s911_s6 + $0x10] sm:$0xff] }
  0x22   : > { %450 = vmatpush1.msra.mxu0 %v309_v39  ;;  %521 = vmatpush1.msra.mxu1 %v373_v40  ;;  %v363_v60 = vld [vmem:[%s916_s9 + $0x20] sm:$0xff]  ;;  %v362_v62 = vld [vmem:[%s916_s9 + $0x18] sm:$0xff]  ;;  %v361_v1 = vld [vmem:[%s916_s9 + $0x10] sm:$0xff] }
  0x23   : > { %451 = vmatprep.subr.mxu0 %v308_v41  ;;  %522 = vmatprep.subr.mxu1 %v372_v42  ;;  %v296_v2 = vld [vmem:[%s911_s6 + $0x8] sm:$0xff]  ;;  %v295_v4 = vld [vmem:[%s911_s6] sm:$0xff]  ;;  %v358_v6 = vld [vmem:[%s911_s6 + $0x1f8] sm:$0xff] }
  0x24   : > { %452 = vmatpush1.msra.mxu0 %v307_v43  ;;  %523 = vmatpush1.msra.mxu1 %v371_v44  ;;  %v360_v3 = vld [vmem:[%s916_s9 + $0x8] sm:$0xff]  ;;  %v359_v5 = vld [vmem:[%s916_s9] sm:$0xff]  ;;  %v422_v7 = vld [vmem:[%s916_s9 + $0x1f8] sm:$0xff] }
  0x25   : > { %453 = vmatprep.subr.mxu0 %v306_v45  ;;  %524 = vmatprep.subr.mxu1 %v370_v46  ;;  %v357_v8 = vld [vmem:[%s911_s6 + $0x1f0] sm:$0xff]  ;;  %v356_v10 = vld [vmem:[%s911_s6 + $0x1e8] sm:$0xff]  ;;  %v355_v12 = vld [vmem:[%s911_s6 + $0x1e0] sm:$0xff] }
  0x26   : > { %454 = vmatpush1.msra.mxu0 %v305_v47  ;;  %525 = vmatpush1.msra.mxu1 %v369_v48  ;;  %v421_v9 = vld [vmem:[%s916_s9 + $0x1f0] sm:$0xff]  ;;  %v420_v11 = vld [vmem:[%s916_s9 + $0x1e8] sm:$0xff]  ;;  %v419_v13 = vld [vmem:[%s916_s9 + $0x1e0] sm:$0xff] }
  0x27   : > { %455 = vmatprep.subr.mxu0 %v304_v49  ;;  %526 = vmatprep.subr.mxu1 %v368_v50  ;;  %v354_v14 = vld [vmem:[%s911_s6 + $0x1d8] sm:$0xff]  ;;  %v353_v16 = vld [vmem:[%s911_s6 + $0x1d0] sm:$0xff]  ;;  %v352_v18 = vld [vmem:[%s911_s6 + $0x1c8] sm:$0xff] }
  0x28   : > { %456 = vmatpush1.msra.mxu0 %v303_v51  ;;  %527 = vmatpush1.msra.mxu1 %v367_v52  ;;  %v418_v15 = vld [vmem:[%s916_s9 + $0x1d8] sm:$0xff]  ;;  %v417_v17 = vld [vmem:[%s916_s9 + $0x1d0] sm:$0xff]  ;;  %v416_v19 = vld [vmem:[%s916_s9 + $0x1c8] sm:$0xff] }
  0x29   : > { %457 = vmatprep.subr.mxu0 %v302_v53  ;;  %528 = vmatprep.subr.mxu1 %v366_v54  ;;  %v351_v20 = vld [vmem:[%s911_s6 + $0x1c0] sm:$0xff]  ;;  %v350_v22 = vld [vmem:[%s911_s6 + $0x1b8] sm:$0xff]  ;;  %v349_v24 = vld [vmem:[%s911_s6 + $0x1b0] sm:$0xff] }
  0x2a   : > { %458 = vmatpush1.msra.mxu0 %v301_v55  ;;  %529 = vmatpush1.msra.mxu1 %v365_v56  ;;  %v415_v21 = vld [vmem:[%s916_s9 + $0x1c0] sm:$0xff]  ;;  %v414_v23 = vld [vmem:[%s916_s9 + $0x1b8] sm:$0xff]  ;;  %v413_v25 = vld [vmem:[%s916_s9 + $0x1b0] sm:$0xff] }
  0x2b   : > { %459 = vmatprep.subr.mxu0 %v300_v57  ;;  %530 = vmatprep.subr.mxu1 %v364_v58  ;;  %v348_v26 = vld [vmem:[%s911_s6 + $0x1a8] sm:$0xff]  ;;  %v347_v28 = vld [vmem:[%s911_s6 + $0x1a0] sm:$0xff]  ;;  %v346_v30 = vld [vmem:[%s911_s6 + $0x198] sm:$0xff] }
  0x2c   : > { %460 = vmatpush1.msra.mxu0 %v299_v59  ;;  %531 = vmatpush1.msra.mxu1 %v363_v60  ;;  %v412_v27 = vld [vmem:[%s916_s9 + $0x1a8] sm:$0xff]  ;;  %v411_v29 = vld [vmem:[%s916_s9 + $0x1a0] sm:$0xff]  ;;  %v410_v31 = vld [vmem:[%s916_s9 + $0x198] sm:$0xff] }
  0x2d   : > { %461 = vmatprep.subr.mxu0 %v298_v61  ;;  %532 = vmatprep.subr.mxu1 %v362_v62  ;;  %v345_v32 = vld [vmem:[%s911_s6 + $0x190] sm:$0xff]  ;;  %v344_v34 = vld [vmem:[%s911_s6 + $0x188] sm:$0xff]  ;;  %v343_v36 = vld [vmem:[%s911_s6 + $0x180] sm:$0xff] }
  0x2e   : > { %462 = vmatpush1.msra.mxu0 %v297_v63  ;;  %533 = vmatpush1.msra.mxu1 %v361_v1  ;;  %v409_v33 = vld [vmem:[%s916_s9 + $0x190] sm:$0xff]  ;;  %v408_v35 = vld [vmem:[%s916_s9 + $0x188] sm:$0xff]  ;;  %v407_v37 = vld [vmem:[%s916_s9 + $0x180] sm:$0xff] }
  0x2f   : > { %463 = vmatprep.subr.mxu0 %v296_v2  ;;  %534 = vmatprep.subr.mxu1 %v360_v3  ;;  %v342_v38 = vld [vmem:[%s911_s6 + $0x178] sm:$0xff]  ;;  %v341_v40 = vld [vmem:[%s911_s6 + $0x170] sm:$0xff]  ;;  %v340_v42 = vld [vmem:[%s911_s6 + $0x168] sm:$0xff] }
  0x30   : > { %464 = vmatpush1.msra.mxu0 %v295_v4  ;;  %535 = vmatpush1.msra.mxu1 %v359_v5  ;;  %v406_v39 = vld [vmem:[%s916_s9 + $0x178] sm:$0xff]  ;;  %v405_v41 = vld [vmem:[%s916_s9 + $0x170] sm:$0xff]  ;;  %v404_v43 = vld [vmem:[%s916_s9 + $0x168] sm:$0xff] }
  0x31   : > { %465 = vmatprep.subr.mxu0 %v358_v6  ;;  %536 = vmatprep.subr.mxu1 %v422_v7  ;;  %v339_v44 = vld [vmem:[%s911_s6 + $0x160] sm:$0xff]  ;;  %v338_v46 = vld [vmem:[%s911_s6 + $0x158] sm:$0xff]  ;;  %v337_v48 = vld [vmem:[%s911_s6 + $0x150] sm:$0xff] }
  0x32   : > { %466 = vmatpush2.msra.mxu0 %v357_v8  ;;  %537 = vmatpush2.msra.mxu1 %v421_v9  ;;  %v403_v45 = vld [vmem:[%s916_s9 + $0x160] sm:$0xff]  ;;  %v402_v47 = vld [vmem:[%s916_s9 + $0x158] sm:$0xff]  ;;  %v401_v49 = vld [vmem:[%s916_s9 + $0x150] sm:$0xff] }
  0x33   : > { %467 = vmatprep.subr.mxu0 %v356_v10  ;;  %538 = vmatprep.subr.mxu1 %v420_v11  ;;  %v336_v50 = vld [vmem:[%s911_s6 + $0x148] sm:$0xff]  ;;  %v335_v52 = vld [vmem:[%s911_s6 + $0x140] sm:$0xff]  ;;  %v334_v54 = vld [vmem:[%s911_s6 + $0x138] sm:$0xff] }
  0x34   : > { %468 = vmatpush2.msra.mxu0 %v355_v12  ;;  %539 = vmatpush2.msra.mxu1 %v419_v13  ;;  %v400_v51 = vld [vmem:[%s916_s9 + $0x148] sm:$0xff]  ;;  %v399_v53 = vld [vmem:[%s916_s9 + $0x140] sm:$0xff]  ;;  %v398_v55 = vld [vmem:[%s916_s9 + $0x138] sm:$0xff] }
  0x35   : > { %469 = vmatprep.subr.mxu0 %v354_v14  ;;  %540 = vmatprep.subr.mxu1 %v418_v15  ;;  %v333_v56 = vld [vmem:[%s911_s6 + $0x130] sm:$0xff]  ;;  %v332_v58 = vld [vmem:[%s911_s6 + $0x128] sm:$0xff]  ;;  %v331_v60 = vld [vmem:[%s911_s6 + $0x120] sm:$0xff] }
  0x36   : > { %470 = vmatpush2.msra.mxu0 %v353_v16  ;;  %541 = vmatpush2.msra.mxu1 %v417_v17  ;;  %v397_v57 = vld [vmem:[%s916_s9 + $0x130] sm:$0xff]  ;;  %v396_v59 = vld [vmem:[%s916_s9 + $0x128] sm:$0xff]  ;;  %v395_v61 = vld [vmem:[%s916_s9 + $0x120] sm:$0xff] }
  0x37   : > { %471 = vmatprep.subr.mxu0 %v352_v18  ;;  %542 = vmatprep.subr.mxu1 %v416_v19  ;;  %v330_v62 = vld [vmem:[%s911_s6 + $0x118] sm:$0xff]  ;;  %v329_v1 = vld [vmem:[%s911_s6 + $0x110] sm:$0xff]  ;;  %v328_v3 = vld [vmem:[%s911_s6 + $0x108] sm:$0xff] }
  0x38   : > { %472 = vmatpush2.msra.mxu0 %v351_v20  ;;  %543 = vmatpush2.msra.mxu1 %v415_v21  ;;  %v394_v63 = vld [vmem:[%s916_s9 + $0x118] sm:$0xff]  ;;  %v393_v2 = vld [vmem:[%s916_s9 + $0x110] sm:$0xff]  ;;  %v392_v4 = vld [vmem:[%s916_s9 + $0x108] sm:$0xff] }
  0x39   : > { %473 = vmatprep.subr.mxu0 %v350_v22  ;;  %544 = vmatprep.subr.mxu1 %v414_v23  ;;  %v327_v5 = vld [vmem:[%s911_s6 + $0x100] sm:$0xff] }
  0x3a   : > { %474 = vmatpush2.msra.mxu0 %v349_v24  ;;  %545 = vmatpush2.msra.mxu1 %v413_v25  ;;  %v391_v6 = vld [vmem:[%s916_s9 + $0x100] sm:$0xff] }
  0x3b   : > { %475 = vmatprep.subr.mxu0 %v348_v26  ;;  %546 = vmatprep.subr.mxu1 %v412_v27 }
  0x3c   : > { %476 = vmatpush2.msra.mxu0 %v347_v28  ;;  %547 = vmatpush2.msra.mxu1 %v411_v29 }
  0x3d   : > { %477 = vmatprep.subr.mxu0 %v346_v30  ;;  %548 = vmatprep.subr.mxu1 %v410_v31 }
  0x3e   : > { %478 = vmatpush2.msra.mxu0 %v345_v32  ;;  %549 = vmatpush2.msra.mxu1 %v409_v33 }
  0x3f   : > { %479 = vmatprep.subr.mxu0 %v344_v34  ;;  %550 = vmatprep.subr.mxu1 %v408_v35 }
  0x40   : > { %480 = vmatpush2.msra.mxu0 %v343_v36  ;;  %551 = vmatpush2.msra.mxu1 %v407_v37 }
  0x41   : > { %481 = vmatprep.subr.mxu0 %v342_v38  ;;  %552 = vmatprep.subr.mxu1 %v406_v39 }
  0x42   : > { %482 = vmatpush2.msra.mxu0 %v341_v40  ;;  %553 = vmatpush2.msra.mxu1 %v405_v41 }
  0x43   : > { %483 = vmatprep.subr.mxu0 %v340_v42  ;;  %554 = vmatprep.subr.mxu1 %v404_v43 }
  0x44   : > { %484 = vmatpush2.msra.mxu0 %v339_v44  ;;  %555 = vmatpush2.msra.mxu1 %v403_v45 }
  0x45   : > { %485 = vmatprep.subr.mxu0 %v338_v46  ;;  %556 = vmatprep.subr.mxu1 %v402_v47 }
  0x46   : > { %486 = vmatpush2.msra.mxu0 %v337_v48  ;;  %557 = vmatpush2.msra.mxu1 %v401_v49 }
  0x47   : > { %487 = vmatprep.subr.mxu0 %v336_v50  ;;  %558 = vmatprep.subr.mxu1 %v400_v51 }
  0x48   : > { %488 = vmatpush2.msra.mxu0 %v335_v52  ;;  %559 = vmatpush2.msra.mxu1 %v399_v53 }
  0x49   : > { %489 = vmatprep.subr.mxu0 %v334_v54  ;;  %560 = vmatprep.subr.mxu1 %v398_v55 }
  0x4a   : > { %490 = vmatpush2.msra.mxu0 %v333_v56  ;;  %561 = vmatpush2.msra.mxu1 %v397_v57 }
  0x4b   : > { %491 = vmatprep.subr.mxu0 %v332_v58  ;;  %562 = vmatprep.subr.mxu1 %v396_v59 }
  0x4c   : > { %492 = vmatpush2.msra.mxu0 %v331_v60  ;;  %563 = vmatpush2.msra.mxu1 %v395_v61 }
  0x4d   : > { %493 = vmatprep.subr.mxu0 %v330_v62  ;;  %564 = vmatprep.subr.mxu1 %v394_v63 }
  0x4e   : > { %494 = vmatpush2.msra.mxu0 %v329_v1  ;;  %565 = vmatpush2.msra.mxu1 %v393_v2 }
  0x4f   : > { %495 = vmatprep.subr.mxu0 %v328_v3  ;;  %566 = vmatprep.subr.mxu1 %v392_v4 }
  0x50   : > { %496 = vmatpush2.msra.mxu0 %v327_v5  ;;  %567 = vmatpush2.msra.mxu1 %v391_v6 }
  0x51   : > { %498 = vmatmul.mubr.f32.vlgmr.msra.gmra.mxu0 %v895_v0  ;;  %569 = vmatmul.mubr.f32.vlgmr.msra.gmra.mxu1 %v895_v0 }
  0x89   : > { %v428_v7 = vpop.permute.xlu0 %427 }
 0x111   : > { %v499_v8 = vpop.f32.mrf.mxu0  ;;  %v570_v9 = vpop.f32.mrf.mxu1 }
 0x112   : > { %v1048_v10 = vadd.f32 %v499_v8, %v428_v7  ;;  %v1050_v11 = vadd.f32 %v570_v9, %v428_v7 }
 0x113   : > { %v501_v12 = vpop.f32.mrf.mxu0  ;;  %v572_v13 = vpop.f32.mrf.mxu1 }
 0x114   : > { %v575_v14 = vmul.f32 %v1048_v10, %v1048_v10  ;;  %v610_v15 = vmul.f32 %v1050_v11, %v1050_v11  ;;  %v1056_v16 = vadd.f32 %v501_v12, %v428_v7  ;;  %v1058_v17 = vadd.f32 %v572_v13, %v428_v7 }
 0x116   : > { %v578_v0 = vsel %vm577_vm0, %v575_v14, 0.0  ;;  %v612_v18 = vsel %vm577_vm0, %v610_v15, 0.0  ;;  %v576_v19 = vmul.f32 %v1056_v16, %v1056_v16  ;;  %v611_v20 = vmul.f32 %v1058_v17, %v1058_v17 }
 0x117   : > { %v579_v21 = vrot.slane %v578_v0, 4  ;;  %v613_v22 = vrot.slane %v612_v18, 4 }
 0x118   : > { %v585_v23 = vsel %vm577_vm0, %v576_v19, 0.0  ;;  %v619_v24 = vsel %vm577_vm0, %v611_v20, 0.0 }
 0x119   : > { %v580_v25 = vadd.f32 %v579_v21, %v578_v0  ;;  %v614_v26 = vadd.f32 %v613_v22, %v612_v18  ;;  %v586_v27 = vrot.slane %v585_v23, 4  ;;  %v620_v28 = vrot.slane %v619_v24, 4  ;;  %v656_v22 = vpop.permute.xlu0 %655 }
 0x11b   : > { %v581_v29 = vrot.slane %v580_v25, 2  ;;  %v615_v30 = vrot.slane %v614_v26, 2  ;;  %v587_v31 = vadd.f32 %v586_v27, %v585_v23  ;;  %v621_v32 = vadd.f32 %v620_v28, %v619_v24 }
 0x11d   : > { %v582_v33 = vadd.f32 %v581_v29, %v580_v25  ;;  %v616_v34 = vadd.f32 %v615_v30, %v614_v26  ;;  %v588_v35 = vrot.slane %v587_v31, 2  ;;  %v622_v36 = vrot.slane %v621_v32, 2 }
 0x11f   : > { %v583_v37 = vrot.slane %v582_v33, 1  ;;  %v617_v38 = vrot.slane %v616_v34, 1  ;;  %v589_v39 = vadd.f32 %v588_v35, %v587_v31  ;;  %v623_v40 = vadd.f32 %v622_v36, %v621_v32 }
 0x121   : > { %v584_v41 = vadd.f32 %v583_v37, %v582_v33  ;;  %v618_v42 = vadd.f32 %v617_v38, %v616_v34  ;;  %v590_v43 = vrot.slane %v589_v39, 1  ;;  %v624_v44 = vrot.slane %v623_v40, 1 }
 0x123   : > { %803 = vrsqrt.f32 %v584_v41  ;;  %v591_v45 = vadd.f32 %v590_v43, %v589_v39  ;;  %v625_v46 = vadd.f32 %v624_v44, %v623_v40  ;;  %vm594_vm1 = vcmp.eq.f32.partialorder %v584_v41, inf }
 0x124   : > { %805 = vrsqrt.f32 %v618_v42  ;;  %v597_v50 = vand.u32 2147483648, %v584_v41  ;;  %vm596_vm2 = vcmp.eq.f32.partialorder %v584_v41, 0.0  ;;  %vm628_vm3 = vcmp.eq.f32.partialorder %v618_v42, inf }
 0x125   : > { %807 = vrsqrt.f32 %v591_v45  ;;  %v631_v53 = vand.u32 2147483648, %v618_v42  ;;  %vm630_vm4 = vcmp.eq.f32.partialorder %v618_v42, 0.0  ;;  %vm601_vm5 = vcmp.eq.f32.partialorder %v591_v45, inf }
 0x126   : > { %809 = vrsqrt.f32 %v625_v46  ;;  %vm603_vm6 = vcmp.eq.f32.partialorder %v591_v45, 0.0  ;;  %v604_v62 = vand.u32 2147483648, %v591_v45  ;;  %vm635_vm7 = vcmp.eq.f32.partialorder %v625_v46, inf }
 0x127   : > { %v638_v2 = vand.u32 2147483648, %v625_v46  ;;  %vm637_vm8 = vcmp.eq.f32.partialorder %v625_v46, 0.0 }
 0x130   : > { %v804_v47 = vpop.eup %803 }
 0x131   : > { %v806_v48 = vpop.eup %805  ;;  %v593_v49 = vmul.f32 %v804_v47, %v584_v41 }
 0x132   : > { %v627_v51 = vmul.f32 %v806_v48, %v618_v42  ;;  %v808_v54 = vpop.eup %807 }
 0x133   : > { %v595_v52 = vsel %vm594_vm1, %v584_v41, %v593_v49  ;;  %v810_v57 = vpop.eup %809  ;;  %v600_v60 = vmul.f32 %v808_v54, %v591_v45 }
 0x134   : > { %v598_v55 = vsel %vm596_vm2, %v597_v50, %v595_v52  ;;  %v629_v56 = vsel %vm628_vm3, %v618_v42, %v627_v51  ;;  %v634_v63 = vmul.f32 %v810_v57, %v625_v46 }
 0x135   : > { %v606_v58 = vadd.f32 1e-10, %v598_v55  ;;  %v632_v59 = vsel %vm630_vm4, %v631_v53, %v629_v56  ;;  %v602_v1 = vsel %vm601_vm5, %v591_v45, %v600_v60 }
 0x136   : > { %v640_v61 = vadd.f32 1e-10, %v632_v59  ;;  %v605_v3 = vsel %vm603_vm6, %v604_v62, %v602_v1  ;;  %v636_v4 = vsel %vm635_vm7, %v625_v46, %v634_v63 }
 0x137   : > { %811 = vrcp.f32 %v606_v58  ;;  %v607_v5 = vadd.f32 1e-10, %v605_v3  ;;  %v639_v6 = vsel %vm637_vm8, %v638_v2, %v636_v4 }
 0x138   : > { %813 = vrcp.f32 %v640_v61  ;;  %v641_v7 = vadd.f32 1e-10, %v639_v6 }
 0x139   : > { %815 = vrcp.f32 %v607_v5 }
 0x13a   : > { %817 = vrcp.f32 %v641_v7 }
 0x144   : > { %v812_v8 = vpop.eup %811 }
 0x145   : > { %v814_v9 = vpop.eup %813  ;;  %v644_v12 = vmul.f32 %v812_v8, %v1048_v10 }
 0x146   : > { %v646_v13 = vmul.f32 %v814_v9, %v1050_v11  ;;  %v816_v14 = vpop.eup %815 }
 0x147   : > { %v818_v0 = vpop.eup %817  ;;  %v645_v18 = vmul.f32 %v816_v14, %v1056_v16 }
 0x148   : > { %v648_v15 = vsub.f32 %v644_v12, %v646_v13  ;;  %v647_v20 = vmul.f32 %v818_v0, %v1058_v17 }
 0x14a   : > { %v651_v19 = vmul.f32 %v648_v15, %v648_v15  ;;  %v649_v21 = vsub.f32 %v645_v18, %v647_v20 }
 0x14c   : > { %v658_v23 = vmul.f32 %v656_v22, %v651_v19  ;;  %v652_v24 = vmul.f32 %v649_v21, %v649_v21 }
 0x14e   : > { %v659_v25 = vmul.f32 %v656_v22, %v652_v24  ;;  %v660_v26 = vsel %vm577_vm0, %v658_v23, 0.0 }
 0x150   : > { %v661_v10 = vsel %vm577_vm0, %v659_v25, 0.0 }
 0x151   : > { %v662_v27 = vadd.f32 %v661_v10, %v660_v26 }
 0x153   : > { %663 = vadd.xlane.f32.xlu1 %v662_v27 }
 0x1dc   : > { %v664_v11 = vpop.xlane.xlu1 %663 }
 0x1dd   : > { %666 = vst.msk [vmem:[%s294_s13] sm:$0x7] %vm665_vm9, %v664_v11 }
 0x1de PF: > { %s15_s20 = sadd.s32 1, %s841_s20   ;;  %s1093_s18 = smov %s837_s19 }
 0x1df   : > { %p12_p5 = scmp.ge.s32.totalorder %s15_s20, 4   ;;  %s1094_s19 = smov %s1096_s21 }
 0x1e1   :  { %14 = sbr.rel (!%p12_p5) target bundleno = 2 (0x2), region = 73 }

</bundles_post_ra>
